<compile_context>
chip_gen: v6e
topology: v6e:2x2x1
jax: 0.10.0
libtpu: 0.0.40
codegen_flags: <defaults>
</compile_context>

<pallas_src>
import jax
import jax.numpy as jnp
from jax.experimental import pallas as pl
from jax.experimental.pallas import tpu as pltpu

B, T, D = 2, 16, 32          # batch, time, in_channels
K = 7                        # depthwise kernel_size (odd -> SAME padding)
PAD = (K - 1) // 2
EXP = 2                      # expansion_factor (module only supports 2)
N_ROWS = B * T               # flattened (batch, time) rows
NVEC = 16                    # rows in the packed per-channel-vector slab
LN_EPS = 1e-5
BN_EPS = 1e-5

# Packed per-channel-vector slab row layout (all rows are width D):
#   0: ln_gamma   1: ln_beta   2: b1_value  3: b1_gate
#   4: bn_scale   5: bn_shift  6: b2        7: zero pad
#   8..14: depthwise taps wd[0..K-1]        15: zero pad
# Packed weight slab row layout (shape (3*D, D)):
#   [0:D)   = w1_value^T   [D:2D) = w1_gate^T   [2D:3D) = w2^T


def _conformer_conv_kernel(x_ref, pv_ref, w_ref, o_ref):
    x = x_ref[...].astype(jnp.float32)                    # (N_ROWS, D)

    ln_g = pv_ref[0:1, :]
    ln_b = pv_ref[1:2, :]
    b1v = pv_ref[2:3, :]
    b1g = pv_ref[3:4, :]
    bn_s = pv_ref[4:5, :]
    bn_b = pv_ref[5:6, :]
    b2 = pv_ref[6:7, :]

    # --- LayerNorm over channel dim D (biased variance, like torch) ---
    mean = jnp.mean(x, axis=-1, keepdims=True)
    xc = x - mean
    var = jnp.mean(xc * xc, axis=-1, keepdims=True)
    ln = xc * jax.lax.rsqrt(var + LN_EPS) * ln_g + ln_b

    # --- Pointwise conv (D -> 2D, bias) + GLU: two lane-aligned matmuls ---
    hv = jnp.dot(ln, w_ref[0:D, :], preferred_element_type=jnp.float32) + b1v
    hg = jnp.dot(ln, w_ref[D:2 * D, :], preferred_element_type=jnp.float32) + b1g
    g = hv * jax.nn.sigmoid(hg)                            # (N_ROWS, D)

    # --- Depthwise conv over time, SAME zero padding ---
    # Row r is flattened (batch, time).  Tap at time offset s = k - PAD pulls
    # the circularly rolled row (r + s) mod N_ROWS; the time-index mask kills
    # every out-of-segment (and therefore every wrapped / cross-batch) tap, so
    # the circular rotation is exactly equivalent to SAME zero padding.
    t_idx = jax.lax.broadcasted_iota(jnp.int32, (N_ROWS, D), 0) % T
    y = jnp.zeros((N_ROWS, D), jnp.float32)
    for k in range(K):                                     # static unroll, small K
        s = k - PAD
        tap = g if s == 0 else pltpu.roll(g, shift=(-s) % N_ROWS, axis=0)
        valid = jnp.logical_and(t_idx + s >= 0, t_idx + s < T)
        y = y + jnp.where(valid, tap, 0.0) * pv_ref[8 + k:9 + k, :]

    # --- BatchNorm1d (eval mode, folded into scale/shift) + Swish ---
    ybn = y * bn_s + bn_b
    z = ybn * jax.nn.sigmoid(ybn)

    # --- Pointwise conv (D -> D, bias) ---
    out = jnp.dot(z, w_ref[2 * D:3 * D, :], preferred_element_type=jnp.float32) + b2
    # TODO(synk): Dropout(p=0.1) and training-mode BatchNorm (batch statistics)
    # are not implemented; eval-mode semantics are used (dropout = identity).
    o_ref[...] = out.astype(o_ref.dtype)


def pack_params(params):
    """Pack module parameters into two VMEM-friendly slabs (done once)."""
    ln_g, ln_b, w1t, b1, wd, bn_scale, bn_shift, w2t, b2 = params
    # Lane-aligned GLU: split the D->2D pointwise conv into value/gate halves
    # so the kernel never touches a vreg at lane offset D.
    w1v, w1g = w1t[:, :D], w1t[:, D:]
    b1v, b1g = b1[:, :D], b1[:, D:]
    zrow = jnp.zeros((1, D), jnp.float32)
    pvec = jnp.concatenate(
        [ln_g, ln_b, b1v, b1g, bn_scale, bn_shift, b2, zrow, wd, zrow], axis=0)
    assert pvec.shape == (NVEC, D)
    wslab = jnp.concatenate([w1v, w1g, w2t], axis=0)       # (3*D, D)
    return pvec, wslab


def conformer_conv_module(x, packed):
    pvec, wslab = packed
    x_rows = x.reshape(N_ROWS, D)                          # contiguous -> free

    def full(shape):
        return pl.BlockSpec(shape, lambda i: (0,) * len(shape))

    grid_spec = pltpu.PrefetchScalarGridSpec(
        num_scalar_prefetch=0,
        grid=(1,),            # whole (tiny) problem in one step
        in_specs=[
            full((N_ROWS, D)),        # x (flattened rows, no halo)
            full((NVEC, D)),          # packed per-channel vectors + dw taps
            full((3 * D, D)),         # packed weight slab (w1v | w1g | w2)^T
        ],
        out_specs=full((N_ROWS, D)),
    )
    out = pl.pallas_call(
        _conformer_conv_kernel,
        out_shape=jax.ShapeDtypeStruct((N_ROWS, D), jnp.float32),
        grid_spec=grid_spec,
        compiler_params=pltpu.CompilerParams(
            dimension_semantics=("parallel",)),
    )(x_rows, pvec, wslab)
    return out.reshape(B, T, D)


def reference(x, params):
    ln_g, ln_b, w1t, b1, wd, bn_scale, bn_shift, w2t, b2 = params
    mean = x.mean(-1, keepdims=True)
    var = ((x - mean) ** 2).mean(-1, keepdims=True)
    ln = (x - mean) / jnp.sqrt(var + LN_EPS) * ln_g + ln_b
    h = ln @ w1t + b1
    g = h[..., :D] * jax.nn.sigmoid(h[..., D:])
    gp = jnp.pad(g, ((0, 0), (PAD, PAD), (0, 0)))
    y = sum(gp[:, k:k + T, :] * wd[k] for k in range(K))
    ybn = y * bn_scale + bn_shift
    z = ybn * jax.nn.sigmoid(ybn)
    return z @ w2t + b2


if __name__ == "__main__":
    key = jax.random.PRNGKey(0)
    ks = jax.random.split(key, 12)
    x = jax.random.normal(ks[0], (B, T, D), jnp.float32)

    # Deterministic synthetic parameters (shapes follow the PyTorch __init__).
    ln_g = 1.0 + 0.1 * jax.random.normal(ks[1], (1, D), jnp.float32)
    ln_b = 0.1 * jax.random.normal(ks[2], (1, D), jnp.float32)
    # PointwiseConv1d(D, 2D): torch weight (2D, D, 1) -> store transposed (D, 2D)
    w1t = jax.random.normal(ks[3], (D, EXP * D), jnp.float32) / jnp.sqrt(D)
    b1 = 0.1 * jax.random.normal(ks[4], (1, EXP * D), jnp.float32)
    # DepthwiseConv1d(D, D, K): torch weight (D, 1, K) -> store as (K, D)
    wd = jax.random.normal(ks[5], (K, D), jnp.float32) / jnp.sqrt(K)
    # BatchNorm1d(D) eval-mode params folded into scale/shift.
    bn_gamma = 1.0 + 0.1 * jax.random.normal(ks[6], (1, D), jnp.float32)
    bn_beta = 0.1 * jax.random.normal(ks[7], (1, D), jnp.float32)
    bn_mean = 0.1 * jax.random.normal(ks[8], (1, D), jnp.float32)
    bn_var = 0.5 + jnp.abs(jax.random.normal(ks[9], (1, D), jnp.float32))
    bn_scale = bn_gamma / jnp.sqrt(bn_var + BN_EPS)
    bn_shift = bn_beta - bn_mean * bn_scale
    # PointwiseConv1d(D, D): torch weight (D, D, 1) -> store transposed (D, D)
    w2t = jax.random.normal(ks[10], (D, D), jnp.float32) / jnp.sqrt(D)
    b2 = 0.1 * jax.random.normal(ks[11], (1, D), jnp.float32)

    params = (ln_g, ln_b, w1t, b1, wd, bn_scale, bn_shift, w2t, b2)
    packed = pack_params(params)

    out = conformer_conv_module(x, packed)
    jax.block_until_ready(out)

    ref = reference(x, params)
    assert out.shape == (B, T, D), out.shape
    assert jnp.allclose(out, ref, atol=1e-4, rtol=1e-4), float(
        jnp.max(jnp.abs(out - ref)))
    print("KERNEL_OK")
</pallas_src>

<mosaic_0001>
module attributes {stable_mosaic.version = 11 : i64} {
  func.func @_conformer_conv_kernel(%arg0: i32, %arg1: memref<32x32xf32, #tpu.memory_space<vmem>>, %arg2: memref<16x32xf32, #tpu.memory_space<vmem>>, %arg3: memref<96x32xf32, #tpu.memory_space<vmem>>, %arg4: memref<32x32xf32, #tpu.memory_space<vmem>>) attributes {dimension_semantics = [#tpu.dimension_semantics<parallel>], iteration_bounds = array<i64: 1>, scalar_prefetch = 0 : i64, scratch_operands = 0 : i64, tpu.core_type = #tpu.core_type<tc>, window_params = [{pipeline_mode = #tpu.pipeline_mode<synchronous>, transform_indices = @transform_0, window_bounds = array<i64: 32, 32>}, {pipeline_mode = #tpu.pipeline_mode<synchronous>, transform_indices = @transform_1, window_bounds = array<i64: 16, 32>}, {pipeline_mode = #tpu.pipeline_mode<synchronous>, transform_indices = @transform_2, window_bounds = array<i64: 96, 32>}, {pipeline_mode = #tpu.pipeline_mode<synchronous>, transform_indices = @transform_3, window_bounds = array<i64: 32, 32>}]} {
    %c0 = arith.constant 0 : index
    %c0_0 = arith.constant 0 : index
    %0 = vector.load %arg1[%c0, %c0_0] : memref<32x32xf32, #tpu.memory_space<vmem>>, vector<32x32xf32>
    %c0_1 = arith.constant 0 : index
    %c0_2 = arith.constant 0 : index
    %1 = vector.load %arg2[%c0_1, %c0_2] : memref<16x32xf32, #tpu.memory_space<vmem>>, vector<1x32xf32>
    %c1 = arith.constant 1 : index
    %c0_3 = arith.constant 0 : index
    %2 = vector.load %arg2[%c1, %c0_3] : memref<16x32xf32, #tpu.memory_space<vmem>>, vector<1x32xf32>
    %c2 = arith.constant 2 : index
    %c0_4 = arith.constant 0 : index
    %3 = vector.load %arg2[%c2, %c0_4] : memref<16x32xf32, #tpu.memory_space<vmem>>, vector<1x32xf32>
    %c3 = arith.constant 3 : index
    %c0_5 = arith.constant 0 : index
    %4 = vector.load %arg2[%c3, %c0_5] : memref<16x32xf32, #tpu.memory_space<vmem>>, vector<1x32xf32>
    %c4 = arith.constant 4 : index
    %c0_6 = arith.constant 0 : index
    %5 = vector.load %arg2[%c4, %c0_6] : memref<16x32xf32, #tpu.memory_space<vmem>>, vector<1x32xf32>
    %c5 = arith.constant 5 : index
    %c0_7 = arith.constant 0 : index
    %6 = vector.load %arg2[%c5, %c0_7] : memref<16x32xf32, #tpu.memory_space<vmem>>, vector<1x32xf32>
    %c6 = arith.constant 6 : index
    %c0_8 = arith.constant 0 : index
    %7 = vector.load %arg2[%c6, %c0_8] : memref<16x32xf32, #tpu.memory_space<vmem>>, vector<1x32xf32>
    %cst = arith.constant dense<0.000000e+00> : vector<32xf32>
    %8 = vector.multi_reduction <add>, %0, %cst [1] : vector<32x32xf32> to vector<32xf32>
    %9 = vector.shape_cast %8 : vector<32xf32> to vector<32x1xf32>
    %cst_9 = arith.constant 3.200000e+01 : f32
    %10 = vector.broadcast %cst_9 : f32 to vector<32x1xf32>
    %11 = arith.divf %9, %10 : vector<32x1xf32>
    %12 = vector.broadcast %11 : vector<32x1xf32> to vector<32x32xf32>
    %13 = arith.subf %0, %12 : vector<32x32xf32>
    %14 = arith.mulf %13, %13 : vector<32x32xf32>
    %cst_10 = arith.constant dense<0.000000e+00> : vector<32xf32>
    %15 = vector.multi_reduction <add>, %14, %cst_10 [1] : vector<32x32xf32> to vector<32xf32>
    %16 = vector.shape_cast %15 : vector<32xf32> to vector<32x1xf32>
    %cst_11 = arith.constant 3.200000e+01 : f32
    %17 = vector.broadcast %cst_11 : f32 to vector<32x1xf32>
    %18 = arith.divf %16, %17 : vector<32x1xf32>
    %cst_12 = arith.constant 9.99999974E-6 : f32
    %19 = vector.broadcast %cst_12 : f32 to vector<32x1xf32>
    %20 = arith.addf %18, %19 : vector<32x1xf32>
    %21 = math.rsqrt %20 : vector<32x1xf32>
    %22 = vector.broadcast %21 : vector<32x1xf32> to vector<32x32xf32>
    %23 = arith.mulf %13, %22 : vector<32x32xf32>
    %24 = vector.broadcast %1 : vector<1x32xf32> to vector<32x32xf32>
    %25 = arith.mulf %23, %24 : vector<32x32xf32>
    %26 = vector.broadcast %2 : vector<1x32xf32> to vector<32x32xf32>
    %27 = arith.addf %25, %26 : vector<32x32xf32>
    %c0_13 = arith.constant 0 : index
    %c0_14 = arith.constant 0 : index
    %28 = vector.load %arg3[%c0_13, %c0_14] : memref<96x32xf32, #tpu.memory_space<vmem>>, vector<32x32xf32>
    %cst_15 = arith.constant dense<0.000000e+00> : vector<32x32xf32>
    %29 = tpu.matmul %27, %28, %cst_15 {dimension_numbers = #tpu.dot_dimension_numbers<[1], [0], [0], [1], [0, 0, 1, 1], [], []>} : vector<32x32xf32>, vector<32x32xf32>, vector<32x32xf32> -> vector<32x32xf32>
    %30 = vector.broadcast %3 : vector<1x32xf32> to vector<32x32xf32>
    %31 = arith.addf %29, %30 : vector<32x32xf32>
    %c32 = arith.constant 32 : index
    %c0_16 = arith.constant 0 : index
    %32 = vector.load %arg3[%c32, %c0_16] : memref<96x32xf32, #tpu.memory_space<vmem>>, vector<32x32xf32>
    %cst_17 = arith.constant dense<0.000000e+00> : vector<32x32xf32>
    %33 = tpu.matmul %27, %32, %cst_17 {dimension_numbers = #tpu.dot_dimension_numbers<[1], [0], [0], [1], [0, 0, 1, 1], [], []>} : vector<32x32xf32>, vector<32x32xf32>, vector<32x32xf32> -> vector<32x32xf32>
    %34 = vector.broadcast %4 : vector<1x32xf32> to vector<32x32xf32>
    %35 = arith.addf %33, %34 : vector<32x32xf32>
    %36 = arith.negf %35 : vector<32x32xf32>
    %37 = math.exp %36 : vector<32x32xf32>
    %cst_18 = arith.constant 1.000000e+00 : f32
    %38 = vector.broadcast %cst_18 : f32 to vector<32x32xf32>
    %39 = arith.addf %38, %37 : vector<32x32xf32>
    %40 = arith.divf %38, %39 : vector<32x32xf32>
    %41 = arith.mulf %31, %40 : vector<32x32xf32>
    %42 = tpu.iota {dimensions = array<i32: 0>} : vector<32x32xi32>
    %c16_i32 = arith.constant 16 : i32
    %c0_i32 = arith.constant 0 : i32
    %43 = arith.cmpi eq, %c16_i32, %c0_i32 : i32
    %c1_i32 = arith.constant 1 : i32
    %44 = arith.select %43, %c1_i32, %c16_i32 : i32
    %45 = vector.broadcast %44 : i32 to vector<32x32xi32>
    %46 = arith.remsi %42, %45 : vector<32x32xi32>
    %c0_i32_19 = arith.constant 0 : i32
    %47 = vector.broadcast %c0_i32_19 : i32 to vector<32x32xi32>
    %48 = arith.cmpi ne, %46, %47 : vector<32x32xi32>
    %c0_i32_20 = arith.constant 0 : i32
    %49 = vector.broadcast %c0_i32_20 : i32 to vector<32x32xi32>
    %50 = arith.cmpi slt, %46, %49 : vector<32x32xi32>
    %c0_i32_21 = arith.constant 0 : i32
    %51 = arith.cmpi slt, %44, %c0_i32_21 : i32
    %52 = vector.broadcast %51 : i1 to vector<32x32xi1>
    %53 = vector.broadcast %52 : vector<32x32xi1> to vector<32x32xi1>
    %54 = arith.xori %50, %53 : vector<32x32xi1>
    %55 = arith.andi %54, %48 : vector<32x32xi1>
    %56 = vector.broadcast %44 : i32 to vector<32x32xi32>
    %57 = arith.addi %46, %56 : vector<32x32xi32>
    %58 = arith.select %55, %57, %46 : vector<32x32xi1>, vector<32x32xi32>
    %cst_22 = arith.constant 0.000000e+00 : f32
    %59 = vector.broadcast %cst_22 : f32 to vector<32x32xf32>
    %c3_i32 = arith.constant 3 : i32
    %60 = tpu.dynamic_rotate %41 by %c3_i32 dim 0 : vector<32x32xf32>, i32 -> vector<32x32xf32>
    %c-3_i32 = arith.constant -3 : i32
    %61 = vector.broadcast %c-3_i32 : i32 to vector<32x32xi32>
    %62 = arith.addi %58, %61 : vector<32x32xi32>
    %c0_i32_23 = arith.constant 0 : i32
    %63 = vector.broadcast %c0_i32_23 : i32 to vector<32x32xi32>
    %64 = arith.cmpi sge, %62, %63 : vector<32x32xi32>
    %c-3_i32_24 = arith.constant -3 : i32
    %65 = vector.broadcast %c-3_i32_24 : i32 to vector<32x32xi32>
    %66 = arith.addi %58, %65 : vector<32x32xi32>
    %c16_i32_25 = arith.constant 16 : i32
    %67 = vector.broadcast %c16_i32_25 : i32 to vector<32x32xi32>
    %68 = arith.cmpi slt, %66, %67 : vector<32x32xi32>
    %69 = arith.andi %64, %68 : vector<32x32xi1>
    %cst_26 = arith.constant 0.000000e+00 : f32
    %70 = vector.broadcast %cst_26 : f32 to vector<32x32xf32>
    %71 = arith.select %69, %60, %70 : vector<32x32xi1>, vector<32x32xf32>
    %c8 = arith.constant 8 : index
    %c0_27 = arith.constant 0 : index
    %72 = vector.load %arg2[%c8, %c0_27] : memref<16x32xf32, #tpu.memory_space<vmem>>, vector<1x32xf32>
    %73 = vector.broadcast %72 : vector<1x32xf32> to vector<32x32xf32>
    %74 = arith.mulf %71, %73 : vector<32x32xf32>
    %75 = arith.addf %59, %74 : vector<32x32xf32>
    %c2_i32 = arith.constant 2 : i32
    %76 = tpu.dynamic_rotate %41 by %c2_i32 dim 0 : vector<32x32xf32>, i32 -> vector<32x32xf32>
    %c-2_i32 = arith.constant -2 : i32
    %77 = vector.broadcast %c-2_i32 : i32 to vector<32x32xi32>
    %78 = arith.addi %58, %77 : vector<32x32xi32>
    %c0_i32_28 = arith.constant 0 : i32
    %79 = vector.broadcast %c0_i32_28 : i32 to vector<32x32xi32>
    %80 = arith.cmpi sge, %78, %79 : vector<32x32xi32>
    %c-2_i32_29 = arith.constant -2 : i32
    %81 = vector.broadcast %c-2_i32_29 : i32 to vector<32x32xi32>
    %82 = arith.addi %58, %81 : vector<32x32xi32>
    %c16_i32_30 = arith.constant 16 : i32
    %83 = vector.broadcast %c16_i32_30 : i32 to vector<32x32xi32>
    %84 = arith.cmpi slt, %82, %83 : vector<32x32xi32>
    %85 = arith.andi %80, %84 : vector<32x32xi1>
    %cst_31 = arith.constant 0.000000e+00 : f32
    %86 = vector.broadcast %cst_31 : f32 to vector<32x32xf32>
    %87 = arith.select %85, %76, %86 : vector<32x32xi1>, vector<32x32xf32>
    %c9 = arith.constant 9 : index
    %c0_32 = arith.constant 0 : index
    %88 = vector.load %arg2[%c9, %c0_32] : memref<16x32xf32, #tpu.memory_space<vmem>>, vector<1x32xf32>
    %89 = vector.broadcast %88 : vector<1x32xf32> to vector<32x32xf32>
    %90 = arith.mulf %87, %89 : vector<32x32xf32>
    %91 = arith.addf %75, %90 : vector<32x32xf32>
    %c1_i32_33 = arith.constant 1 : i32
    %92 = tpu.dynamic_rotate %41 by %c1_i32_33 dim 0 : vector<32x32xf32>, i32 -> vector<32x32xf32>
    %c-1_i32 = arith.constant -1 : i32
    %93 = vector.broadcast %c-1_i32 : i32 to vector<32x32xi32>
    %94 = arith.addi %58, %93 : vector<32x32xi32>
    %c0_i32_34 = arith.constant 0 : i32
    %95 = vector.broadcast %c0_i32_34 : i32 to vector<32x32xi32>
    %96 = arith.cmpi sge, %94, %95 : vector<32x32xi32>
    %c-1_i32_35 = arith.constant -1 : i32
    %97 = vector.broadcast %c-1_i32_35 : i32 to vector<32x32xi32>
    %98 = arith.addi %58, %97 : vector<32x32xi32>
    %c16_i32_36 = arith.constant 16 : i32
    %99 = vector.broadcast %c16_i32_36 : i32 to vector<32x32xi32>
    %100 = arith.cmpi slt, %98, %99 : vector<32x32xi32>
    %101 = arith.andi %96, %100 : vector<32x32xi1>
    %cst_37 = arith.constant 0.000000e+00 : f32
    %102 = vector.broadcast %cst_37 : f32 to vector<32x32xf32>
    %103 = arith.select %101, %92, %102 : vector<32x32xi1>, vector<32x32xf32>
    %c10 = arith.constant 10 : index
    %c0_38 = arith.constant 0 : index
    %104 = vector.load %arg2[%c10, %c0_38] : memref<16x32xf32, #tpu.memory_space<vmem>>, vector<1x32xf32>
    %105 = vector.broadcast %104 : vector<1x32xf32> to vector<32x32xf32>
    %106 = arith.mulf %103, %105 : vector<32x32xf32>
    %107 = arith.addf %91, %106 : vector<32x32xf32>
    %c0_i32_39 = arith.constant 0 : i32
    %108 = vector.broadcast %c0_i32_39 : i32 to vector<32x32xi32>
    %109 = arith.addi %58, %108 : vector<32x32xi32>
    %c0_i32_40 = arith.constant 0 : i32
    %110 = vector.broadcast %c0_i32_40 : i32 to vector<32x32xi32>
    %111 = arith.cmpi sge, %109, %110 : vector<32x32xi32>
    %c0_i32_41 = arith.constant 0 : i32
    %112 = vector.broadcast %c0_i32_41 : i32 to vector<32x32xi32>
    %113 = arith.addi %58, %112 : vector<32x32xi32>
    %c16_i32_42 = arith.constant 16 : i32
    %114 = vector.broadcast %c16_i32_42 : i32 to vector<32x32xi32>
    %115 = arith.cmpi slt, %113, %114 : vector<32x32xi32>
    %116 = arith.andi %111, %115 : vector<32x32xi1>
    %cst_43 = arith.constant 0.000000e+00 : f32
    %117 = vector.broadcast %cst_43 : f32 to vector<32x32xf32>
    %118 = arith.select %116, %41, %117 : vector<32x32xi1>, vector<32x32xf32>
    %c11 = arith.constant 11 : index
    %c0_44 = arith.constant 0 : index
    %119 = vector.load %arg2[%c11, %c0_44] : memref<16x32xf32, #tpu.memory_space<vmem>>, vector<1x32xf32>
    %120 = vector.broadcast %119 : vector<1x32xf32> to vector<32x32xf32>
    %121 = arith.mulf %118, %120 : vector<32x32xf32>
    %122 = arith.addf %107, %121 : vector<32x32xf32>
    %c31_i32 = arith.constant 31 : i32
    %123 = tpu.dynamic_rotate %41 by %c31_i32 dim 0 : vector<32x32xf32>, i32 -> vector<32x32xf32>
    %c1_i32_45 = arith.constant 1 : i32
    %124 = vector.broadcast %c1_i32_45 : i32 to vector<32x32xi32>
    %125 = arith.addi %58, %124 : vector<32x32xi32>
    %c0_i32_46 = arith.constant 0 : i32
    %126 = vector.broadcast %c0_i32_46 : i32 to vector<32x32xi32>
    %127 = arith.cmpi sge, %125, %126 : vector<32x32xi32>
    %c1_i32_47 = arith.constant 1 : i32
    %128 = vector.broadcast %c1_i32_47 : i32 to vector<32x32xi32>
    %129 = arith.addi %58, %128 : vector<32x32xi32>
    %c16_i32_48 = arith.constant 16 : i32
    %130 = vector.broadcast %c16_i32_48 : i32 to vector<32x32xi32>
    %131 = arith.cmpi slt, %129, %130 : vector<32x32xi32>
    %132 = arith.andi %127, %131 : vector<32x32xi1>
    %cst_49 = arith.constant 0.000000e+00 : f32
    %133 = vector.broadcast %cst_49 : f32 to vector<32x32xf32>
    %134 = arith.select %132, %123, %133 : vector<32x32xi1>, vector<32x32xf32>
    %c12 = arith.constant 12 : index
    %c0_50 = arith.constant 0 : index
    %135 = vector.load %arg2[%c12, %c0_50] : memref<16x32xf32, #tpu.memory_space<vmem>>, vector<1x32xf32>
    %136 = vector.broadcast %135 : vector<1x32xf32> to vector<32x32xf32>
    %137 = arith.mulf %134, %136 : vector<32x32xf32>
    %138 = arith.addf %122, %137 : vector<32x32xf32>
    %c30_i32 = arith.constant 30 : i32
    %139 = tpu.dynamic_rotate %41 by %c30_i32 dim 0 : vector<32x32xf32>, i32 -> vector<32x32xf32>
    %c2_i32_51 = arith.constant 2 : i32
    %140 = vector.broadcast %c2_i32_51 : i32 to vector<32x32xi32>
    %141 = arith.addi %58, %140 : vector<32x32xi32>
    %c0_i32_52 = arith.constant 0 : i32
    %142 = vector.broadcast %c0_i32_52 : i32 to vector<32x32xi32>
    %143 = arith.cmpi sge, %141, %142 : vector<32x32xi32>
    %c2_i32_53 = arith.constant 2 : i32
    %144 = vector.broadcast %c2_i32_53 : i32 to vector<32x32xi32>
    %145 = arith.addi %58, %144 : vector<32x32xi32>
    %c16_i32_54 = arith.constant 16 : i32
    %146 = vector.broadcast %c16_i32_54 : i32 to vector<32x32xi32>
    %147 = arith.cmpi slt, %145, %146 : vector<32x32xi32>
    %148 = arith.andi %143, %147 : vector<32x32xi1>
    %cst_55 = arith.constant 0.000000e+00 : f32
    %149 = vector.broadcast %cst_55 : f32 to vector<32x32xf32>
    %150 = arith.select %148, %139, %149 : vector<32x32xi1>, vector<32x32xf32>
    %c13 = arith.constant 13 : index
    %c0_56 = arith.constant 0 : index
    %151 = vector.load %arg2[%c13, %c0_56] : memref<16x32xf32, #tpu.memory_space<vmem>>, vector<1x32xf32>
    %152 = vector.broadcast %151 : vector<1x32xf32> to vector<32x32xf32>
    %153 = arith.mulf %150, %152 : vector<32x32xf32>
    %154 = arith.addf %138, %153 : vector<32x32xf32>
    %c29_i32 = arith.constant 29 : i32
    %155 = tpu.dynamic_rotate %41 by %c29_i32 dim 0 : vector<32x32xf32>, i32 -> vector<32x32xf32>
    %c3_i32_57 = arith.constant 3 : i32
    %156 = vector.broadcast %c3_i32_57 : i32 to vector<32x32xi32>
    %157 = arith.addi %58, %156 : vector<32x32xi32>
    %c0_i32_58 = arith.constant 0 : i32
    %158 = vector.broadcast %c0_i32_58 : i32 to vector<32x32xi32>
    %159 = arith.cmpi sge, %157, %158 : vector<32x32xi32>
    %c3_i32_59 = arith.constant 3 : i32
    %160 = vector.broadcast %c3_i32_59 : i32 to vector<32x32xi32>
    %161 = arith.addi %58, %160 : vector<32x32xi32>
    %c16_i32_60 = arith.constant 16 : i32
    %162 = vector.broadcast %c16_i32_60 : i32 to vector<32x32xi32>
    %163 = arith.cmpi slt, %161, %162 : vector<32x32xi32>
    %164 = arith.andi %159, %163 : vector<32x32xi1>
    %cst_61 = arith.constant 0.000000e+00 : f32
    %165 = vector.broadcast %cst_61 : f32 to vector<32x32xf32>
    %166 = arith.select %164, %155, %165 : vector<32x32xi1>, vector<32x32xf32>
    %c14 = arith.constant 14 : index
    %c0_62 = arith.constant 0 : index
    %167 = vector.load %arg2[%c14, %c0_62] : memref<16x32xf32, #tpu.memory_space<vmem>>, vector<1x32xf32>
    %168 = vector.broadcast %167 : vector<1x32xf32> to vector<32x32xf32>
    %169 = arith.mulf %166, %168 : vector<32x32xf32>
    %170 = arith.addf %154, %169 : vector<32x32xf32>
    %171 = vector.broadcast %5 : vector<1x32xf32> to vector<32x32xf32>
    %172 = arith.mulf %170, %171 : vector<32x32xf32>
    %173 = vector.broadcast %6 : vector<1x32xf32> to vector<32x32xf32>
    %174 = arith.addf %172, %173 : vector<32x32xf32>
    %175 = arith.negf %174 : vector<32x32xf32>
    %176 = math.exp %175 : vector<32x32xf32>
    %cst_63 = arith.constant 1.000000e+00 : f32
    %177 = vector.broadcast %cst_63 : f32 to vector<32x32xf32>
    %178 = arith.addf %177, %176 : vector<32x32xf32>
    %179 = arith.divf %177, %178 : vector<32x32xf32>
    %180 = arith.mulf %174, %179 : vector<32x32xf32>
    %c64 = arith.constant 64 : index
    %c0_64 = arith.constant 0 : index
    %181 = vector.load %arg3[%c64, %c0_64] : memref<96x32xf32, #tpu.memory_space<vmem>>, vector<32x32xf32>
    %cst_65 = arith.constant dense<0.000000e+00> : vector<32x32xf32>
    %182 = tpu.matmul %180, %181, %cst_65 {dimension_numbers = #tpu.dot_dimension_numbers<[1], [0], [0], [1], [0, 0, 1, 1], [], []>} : vector<32x32xf32>, vector<32x32xf32>, vector<32x32xf32> -> vector<32x32xf32>
    %183 = vector.broadcast %7 : vector<1x32xf32> to vector<32x32xf32>
    %184 = arith.addf %182, %183 : vector<32x32xf32>
    %c0_66 = arith.constant 0 : index
    %c0_67 = arith.constant 0 : index
    %185 = vector.load %arg4[%c0_66, %c0_67] : memref<32x32xf32, #tpu.memory_space<vmem>>, vector<32x32xf32>
    tpu.vector_store %arg4[%c0_66, %c0_67], %184 {strides = array<i32>} : memref<32x32xf32, #tpu.memory_space<vmem>>, vector<32x32xf32>,
    return
  }
  func.func @transform_0(%arg0: i32) -> (i32, i32) {
    %c0_i32 = arith.constant 0 : i32
    %c0_i32_0 = arith.constant 0 : i32
    %c0_i32_1 = arith.constant 0 : i32
    return %c0_i32, %c0_i32_0 : i32, i32
  }
  func.func @transform_1(%arg0: i32) -> (i32, i32) {
    %c0_i32 = arith.constant 0 : i32
    %c0_i32_0 = arith.constant 0 : i32
    %c0_i32_1 = arith.constant 0 : i32
    return %c0_i32, %c0_i32_0 : i32, i32
  }
  func.func @transform_2(%arg0: i32) -> (i32, i32) {
    %c0_i32 = arith.constant 0 : i32
    %c0_i32_0 = arith.constant 0 : i32
    %c0_i32_1 = arith.constant 0 : i32
    return %c0_i32, %c0_i32_0 : i32, i32
  }
  func.func @transform_3(%arg0: i32) -> (i32, i32) {
    %c0_i32 = arith.constant 0 : i32
    %c0_i32_0 = arith.constant 0 : i32
    %c0_i32_1 = arith.constant 0 : i32
    return %c0_i32, %c0_i32_0 : i32, i32
  }
}

</mosaic_0001>

<bundles_post_ra>
// kernel: tpu_custom_call.1
= control target key start
LH: loop header
LB: loop body
LE: loop exit
PB: predicated region body
PF: predicated region fallthrough
CT: control target
= control target key end

     0   :  { %vm26_vm0 = vcmask 261120   ;;  %s1402_s0 = inlined_call_operand.vmem [shape: f32[32,32], index: 0, kind: input, shape index: {}]   ;;  %s1403_s1 = inlined_call_operand.vmem [shape: f32[16,32], index: 1, kind: input, shape index: {}]   ;;  %s1404_s2 = inlined_call_operand.vmem [shape: f32[96,32], index: 2, kind: input, shape index: {}]   ;;  %s1405_s3 = inlined_call_operand.hbm [shape: f32[32,32], index: 3, kind: output, shape index: {}]  }
   0x1   :  { %v15_v0 = vld [vmem:[%s1402_s0] sm:$0xff]  ;;  %v17_v1 = vld [vmem:[%s1402_s0 + $0x10] sm:$0xff]  ;;  %v16_v2 = vld [vmem:[%s1402_s0 + $0x8] sm:$0xff] }
   0x2   :  { %v27_v3 = vsel %vm26_vm0, %v15_v0, 0.0  ;;  %v33_v4 = vsel %vm26_vm0, %v17_v1, 0.0  ;;  %v18_v5 = vld [vmem:[%s1402_s0 + $0x18] sm:$0xff] }
   0x3   :  { %8 = vsyncpa [#allocation3], 0  ;;  %28 = vadd.xlane.f32.xlu0 %v27_v3  ;;  %34 = vadd.xlane.f32.xlu1 %v33_v4  ;;  %v30_v6 = vsel %vm26_vm0, %v16_v2, 0.0  ;;  %v36_v7 = vsel %vm26_vm0, %v18_v5, 0.0  ;;  %v99_v28 = vld [vmem:[%s1404_s2 + $0x18] sm:$0xff]  ;;  %v98_v30 = vld [vmem:[%s1404_s2 + $0x10] sm:$0xff] }
   0x4   :  { %v204_v29 = vld [vmem:[%s1404_s2 + $0x38] sm:$0xff]  ;;  %883 = vmatprep.subr.mxu0 %v99_v28  ;;  %v203_v31 = vld [vmem:[%s1404_s2 + $0x30] sm:$0xff]  ;;  %v97_v32 = vld [vmem:[%s1404_s2 + $0x8] sm:$0xff]  ;;  %s998_s15 = smov [#allocation2]  }
   0x5   :  { %897 = vmatprep.subr.mxu1 %v204_v29  ;;  %884 = vmatpush3.msra.mxu0 %v99_v28  ;;  %v202_v33 = vld [vmem:[%s1404_s2 + $0x28] sm:$0xff]  ;;  %v96_v34 = vld [vmem:[%s1404_s2] sm:$0xff]  ;;  %v702_v3 = vld [vmem:[%s1404_s2 + $0x50] sm:$0xff]  ;;  %s814_s16 = sshll.u32 %s998_s15, 4  ;;  %s815_s16 = int_to_ptr.vmem [resolvable:$true] %s814_s16 }
   0x6   :  { %898 = vmatpush3.msra.mxu1 %v204_v29  ;;  %885 = vmatprep.subr.mxu0 %v98_v30  ;;  %v201_v35 = vld [vmem:[%s1404_s2 + $0x20] sm:$0xff]  ;;  %v701_v4 = vld [vmem:[%s1404_s2 + $0x48] sm:$0xff]  ;;  %p981_p1 = scmp.lt.s32.totalorder %s815_s16, %s815_s16 }
   0x7   :  { %31 = vadd.xlane.f32.xlu0 %v30_v6  ;;  %37 = vadd.xlane.f32.xlu1 %v36_v7  ;;  %v825_v49 = vld [vmem:[%s1403_s1] ss:$0 sm:$0xff]  ;;  %v826_v51 = vld [vmem:[%s1403_s1 + $0x1] ss:$0 sm:$0xff]  ;;  %v832_v6 = vld [vmem:[%s1403_s1 + $0x3] ss:$0 sm:$0xff] }
   0x8   :  { %899 = vmatprep.subr.mxu1 %v203_v31  ;;  %886 = vmatpush3.msra.mxu0 %v98_v30 }
   0x9   :  { %900 = vmatpush3.msra.mxu1 %v203_v31  ;;  %887 = vmatprep.subr.mxu0 %v97_v32 }
   0xa   :  { %888 = vmatpush3.msra.mxu0 %v97_v32  ;;  %901 = vmatprep.subr.mxu1 %v202_v33 }
   0xb   :  { %889 = vmatprep.subr.mxu0 %v96_v34  ;;  %902 = vmatpush3.msra.mxu1 %v202_v33 }
   0xc   :  { %890 = vmatpush3.msra.mxu0 %v96_v34  ;;  %903 = vmatprep.subr.mxu1 %v201_v35 }
   0xd   :  { %904 = vmatpush3.msra.mxu1 %v201_v35 }
  0x8c   :  { %v29_v8 = vpop.xlane.xlu0 %28  ;;  %v35_v9 = vpop.xlane.xlu1 %34 }
  0x8d   :  { %v40_v10 = vmul.f32 0.03125, %v29_v8  ;;  %v42_v11 = vmul.f32 0.03125, %v35_v9 }
  0x8f   :  { %v44_v12 = vsub.f32 %v15_v0, %v40_v10  ;;  %v1037_v13 = vsub.f32 %v17_v1, %v42_v11 }
  0x90   :  { %v32_v14 = vpop.xlane.xlu0 %31  ;;  %v38_v15 = vpop.xlane.xlu1 %37 }
  0x91   :  { %v41_v16 = vmul.f32 0.03125, %v32_v14  ;;  %v43_v17 = vmul.f32 0.03125, %v38_v15  ;;  %v48_v18 = vmul.f32 %v44_v12, %v44_v12  ;;  %v50_v19 = vmul.f32 %v1037_v13, %v1037_v13 }
  0x93   :  { %v45_v20 = vsub.f32 %v16_v2, %v41_v16  ;;  %v1041_v21 = vsub.f32 %v18_v5, %v43_v17  ;;  %v52_v22 = vsel %vm26_vm0, %v48_v18, 0.0  ;;  %v58_v23 = vsel %vm26_vm0, %v50_v19, 0.0  ;;  %v703_v2 = vld [vmem:[%s1404_s2 + $0x58] sm:$0xff]  ;;  %v700_v5 = vld [vmem:[%s1404_s2 + $0x40] sm:$0xff] }
  0x94   :  { %53 = vadd.xlane.f32.xlu0 %v52_v22  ;;  %911 = vmatprep.subr.mxu0 %v703_v2  ;;  %v322_v19 = vlaneseq }
  0x95   :  { %v49_v24 = vmul.f32 %v45_v20, %v45_v20  ;;  %v51_v25 = vmul.f32 %v1041_v21, %v1041_v21  ;;  %925 = vmatprep.subr.mxu1 %v703_v2 }
  0x97   :  { %v55_v26 = vsel %vm26_vm0, %v49_v24, 0.0  ;;  %v61_v27 = vsel %vm26_vm0, %v51_v25, 0.0  ;;  %v1104_v25 = vshrl.u32 %v322_v19, 7 }
  0x98   :  { %59 = vadd.xlane.f32.xlu0 %v58_v23  ;;  %56 = vadd.xlane.f32.xlu1 %v55_v26 }
  0x99   :  { %v326_v31 = vadd.s32 24, %v1104_v25  ;;  %v331_v32 = vand.u32 15, %v1104_v25  ;;  %v324_v33 = vadd.s32 8, %v1104_v25  ;;  %v325_v34 = vadd.s32 16, %v1104_v25 }
  0x9a   :  { %vm379_vm1 = vcmp.lt.s32.totalorder %v1104_v25, 3  ;;  %vm421_vm2 = vcmp.lt.s32.totalorder %v1104_v25, 2  ;;  %vm463_vm3 = vcmp.lt.s32.totalorder %v1104_v25, 1  ;;  %vm534_vm7 = vcmp.lt.s32.totalorder %v1104_v25, 7 }
  0x9b   :  { %vm576_vm10 = vcmp.lt.s32.totalorder %v1104_v25, 6  ;;  %vm618_vm13 = vcmp.lt.s32.totalorder %v1104_v25, 5 }
  0x9c   :  { %62 = vadd.xlane.f32.xlu1 %v61_v27 }
 0x11d   :  { %v54_v36 = vpop.xlane.xlu0 %53 }
 0x11e   :  { %v64_v37 = vmul.f32 0.03125, %v54_v36  ;;  %v352_v36 = vand.u32 15, %v326_v31 }
 0x120   :  { %v68_v38 = vadd.f32 1e-05, %v64_v37  ;;  %v1110_v37 = vadd.s32 4294967293, %v331_v32 }
 0x121   :  { %v57_v39 = vpop.xlane.xlu1 %56  ;;  %v60_v40 = vpop.xlane.xlu0 %59 }
 0x122   :  { %936 = vrsqrt.f32 %v68_v38  ;;  %v65_v41 = vmul.f32 0.03125, %v57_v39  ;;  %v66_v42 = vmul.f32 0.03125, %v60_v40  ;;  %v1112_v38 = vadd.s32 4294967294, %v331_v32  ;;  %v827_v39 = vld [vmem:[%s1403_s1 + $0x2] ss:$0 sm:$0xff] }
 0x123   :  { %v338_v40 = vand.u32 15, %v324_v33  ;;  %vm388_vm4 = vcmp.ge.s32.totalorder %v1110_v37, 0 }
 0x124   :  { %v69_v43 = vadd.f32 1e-05, %v65_v41  ;;  %v70_v44 = vadd.f32 1e-05, %v66_v42  ;;  %v345_v41 = vand.u32 15, %v325_v34  ;;  %vm430_vm5 = vcmp.ge.s32.totalorder %v1112_v38, 0 }
 0x125   :  { %v63_v45 = vpop.xlane.xlu1 %62  ;;  %v1222_v34 = vld [vmem:[%s1403_s1 + $0xa] ss:$0 sm:$0xff] }
 0x126   :  { %938 = vrsqrt.f32 %v69_v43  ;;  %v67_v46 = vmul.f32 0.03125, %v63_v45  ;;  %v1124_v45 = vadd.s32 1, %v352_v36 }
 0x127   :  { %940 = vrsqrt.f32 %v70_v44  ;;  %v1122_v44 = vadd.s32 4294967295, %v331_v32 }
 0x128   :  { %v71_v47 = vadd.f32 1e-05, %v67_v46  ;;  %vm550_vm9 = vcmp.lt.s32.totalorder %v1124_v45, 16 }
 0x129   :  { %vm472_vm6 = vcmp.ge.s32.totalorder %v1122_v44, 0 }
 0x12a   :  { %942 = vrsqrt.f32 %v71_v47  ;;  %v1126_v47 = vadd.s32 1, %v338_v40 }
 0x12c   :  { %vm548_vm8 = vcmp.lt.s32.totalorder %v1126_v47, 16 }
 0x12f   :  { %v937_v48 = vpop.eup %936 }
 0x130   :  { %v76_v50 = vmul.f32 %v937_v48, %v44_v12  ;;  %v1128_v48 = vadd.s32 2, %v338_v40 }
 0x132   :  { %v84_v52 = vmul.f32 %v825_v49, %v76_v50  ;;  %v1132_v50 = vadd.s32 3, %v352_v36  ;;  %vm590_vm11 = vcmp.lt.s32.totalorder %v1128_v48, 16 }
 0x133   :  { %v939_v53 = vpop.eup %938 }
 0x134   :  { %v941_v54 = vpop.eup %940  ;;  %v92_v55 = vadd.f32 %v826_v51, %v84_v52  ;;  %v77_v56 = vmul.f32 %v939_v53, %v45_v20  ;;  %v1139_v53 = vld [vmem:[%s1403_s1 + $0xb] ss:$0 sm:$0xff] }
 0x135   :  { %v78_v57 = vmul.f32 %v941_v54, %v1037_v13  ;;  %v1141_v54 = vadd.s32 3, %v338_v40 }
 0x136   :  { %891 = vmatprep.mubr.msk.f32.mxu0 %vm26_vm0, %v92_v55  ;;  %905 = vmatprep.mubr.msk.f32.mxu1 %vm26_vm0, %v92_v55  ;;  %v85_v58 = vmul.f32 %v825_v49, %v77_v56  ;;  %v1143_v55 = vadd.s32 4294967293, %v345_v41 }
 0x137   :  { %v943_v59 = vpop.eup %942  ;;  %v86_v60 = vmul.f32 %v825_v49, %v78_v57  ;;  %vm632_vm15 = vcmp.lt.s32.totalorder %v1141_v54, 16 }
 0x138   :  { %v93_v61 = vadd.f32 %v826_v51, %v85_v58  ;;  %v79_v62 = vmul.f32 %v943_v59, %v1041_v21  ;;  %v1145_v59 = vadd.s32 4294967294, %v345_v41  ;;  %vm390_vm14 = vcmp.ge.s32.totalorder %v1143_v55, 0 }
 0x139   :  { %v94_v63 = vadd.f32 %v826_v51, %v86_v60  ;;  %v1147_v60 = vadd.s32 4294967295, %v345_v41 }
 0x13a   :  { %892 = vmatmul.mubr.msk.f32.vlgmr.msra.gmra.mxu0 %vm26_vm0, %v93_v61  ;;  %906 = vmatmul.mubr.msk.f32.vlgmr.msra.gmra.mxu1 %vm26_vm0, %v93_v61  ;;  %v87_v0 = vmul.f32 %v825_v49, %v79_v62  ;;  %v1130_v49 = vadd.s32 2, %v352_v36 }
 0x13b   :  { %894 = vmatprep.mubr.msk.f32.mxu0 %vm26_vm0, %v94_v63  ;;  %908 = vmatprep.mubr.msk.f32.mxu1 %vm26_vm0, %v94_v63 }
 0x13c   :  { %v95_v1 = vadd.f32 %v826_v51, %v87_v0  ;;  %912 = vmatpush3.msra.mxu0 %v703_v2  ;;  %929 = vmatpush3.msra.mxu1 %v703_v2  ;;  %vm592_vm12 = vcmp.lt.s32.totalorder %v1130_v49, 16 }
 0x13d   :  { %913 = vmatprep.subr.mxu0 %v702_v3  ;;  %926 = vmatprep.subr.mxu1 %v702_v3 }
 0x13e   :  { %895 = vmatmul.mubr.msk.f32.gmra.mxu0 %vm26_vm0, %v95_v1  ;;  %909 = vmatmul.mubr.msk.f32.gmra.mxu1 %vm26_vm0, %v95_v1 }
 0x13f   :  { %914 = vmatpush3.msra.mxu0 %v702_v3  ;;  %930 = vmatpush3.msra.mxu1 %v702_v3 }
 0x140   :  { %915 = vmatprep.subr.mxu0 %v701_v4  ;;  %927 = vmatprep.subr.mxu1 %v701_v4 }
 0x141   :  { %916 = vmatpush3.msra.mxu0 %v701_v4  ;;  %931 = vmatpush3.msra.mxu1 %v701_v4 }
 0x142   :  { %917 = vmatprep.subr.mxu0 %v700_v5  ;;  %928 = vmatprep.subr.mxu1 %v700_v5 }
 0x143   :  { %918 = vmatpush3.msra.mxu0 %v700_v5  ;;  %932 = vmatpush3.msra.mxu1 %v700_v5 }
 0x1fa   :  { %v907_v7 = vpop.f32.mrf.mxu1  ;;  %v893_v23 = vpop.f32.mrf.mxu0 }
 0x1fb   :  { %v281_v8 = vadd.f32 %v907_v7, %v832_v6  ;;  %v188_v42 = vadd.f32 %v893_v23, %v827_v39 }
 0x1fc   :  { %v275_v9 = vpop.f32.mrf.mxu1  ;;  %v182_v29 = vpop.f32.mrf.mxu0 }
 0x1fd   :  { %v838_v10 = vmul.f32 -1.442695, %v281_v8  ;;  %v276_v11 = vadd.f32 %v832_v6, %v275_v9  ;;  %v183_v52 = vadd.f32 %v827_v39, %v182_v29  ;;  %v1169_v8 = vld [vmem:[%s1403_s1 + $0x8] ss:$0 sm:$0xff] }
 0x1fe   :  { %v910_v12 = vpop.f32.mrf.mxu1  ;;  %v896_v35 = vpop.f32.mrf.mxu0 }
 0x1ff   :  { %944 = vpow2.f32 %v838_v10  ;;  %v837_v13 = vmul.f32 -1.442695, %v276_v11  ;;  %v291_v14 = vadd.f32 %v910_v12, %v832_v6  ;;  %v198_v57 = vadd.f32 %v896_v35, %v827_v39 }
 0x200   :  { %v285_v15 = vpop.f32.mrf.mxu1  ;;  %v192_v43 = vpop.f32.mrf.mxu0 }
 0x201   :  { %946 = vpow2.f32 %v837_v13  ;;  %v840_v16 = vmul.f32 -1.442695, %v291_v14  ;;  %v286_v17 = vadd.f32 %v832_v6, %v285_v15  ;;  %v193_v58 = vadd.f32 %v827_v39, %v192_v43 }
 0x203   :  { %948 = vpow2.f32 %v840_v16  ;;  %v839_v18 = vmul.f32 -1.442695, %v286_v17 }
 0x205   :  { %950 = vpow2.f32 %v839_v18 }
 0x20c   :  { %v945_v20 = vpop.eup %944 }
 0x20d   :  { %v307_v21 = vadd.f32 1.0, %v945_v20  ;;  %v1192_v20 = vld [vmem:[%s1403_s1 + $0x9] ss:$0 sm:$0xff] }
 0x20e   :  { %v947_v22 = vpop.eup %946 }
 0x20f   :  { %952 = vrcp.f32 %v307_v21  ;;  %v306_v24 = vadd.f32 1.0, %v947_v22 }
 0x210   :  { %v949_v26 = vpop.eup %948 }
 0x211   :  { %954 = vrcp.f32 %v306_v24  ;;  %v309_v27 = vadd.f32 1.0, %v949_v26 }
 0x212   :  { %v951_v28 = vpop.eup %950 }
 0x213   :  { %956 = vrcp.f32 %v309_v27  ;;  %v308_v30 = vadd.f32 1.0, %v951_v28 }
 0x215   :  { %958 = vrcp.f32 %v308_v30 }
 0x21c   :  { %v953_v46 = vpop.eup %952 }
 0x21d   :  { %v1134_v51 = vmul.f32 %v953_v46, %v188_v42 }
 0x21e   :  { %v955_v56 = vpop.eup %954 }
 0x21f   :  { %v1149_v61 = vmul.f32 %v955_v56, %v183_v52  ;;  %v376_v62 = vrot.slane %v1134_v51, 5  ;;  %v418_v63 = vrot.slane %v1134_v51, 6  ;;  %v460_v0 = vrot.slane %v1134_v51, 7 }
 0x220   :  { %v957_v1 = vpop.eup %956  ;;  %v1157_v2 = vmul.f32 %v1139_v53, %v1134_v51  ;;  %v531_v3 = vrot.slane %v1134_v51, 1  ;;  %v573_v4 = vrot.slane %v1134_v51, 2  ;;  %v615_v5 = vrot.slane %v1134_v51, 3 }
 0x221   :  { %v1163_v6 = vmul.f32 %v957_v1, %v198_v57  ;;  %v375_v7 = vrot.slane %v1149_v61, 5  ;;  %v417_v9 = vrot.slane %v1149_v61, 6  ;;  %v459_v10 = vrot.slane %v1149_v61, 7  ;;  %v1249_v57 = vld [vmem:[%s1403_s1 + $0xc] ss:$0 sm:$0xff] }
 0x222   :  { %v959_v11 = vpop.eup %958  ;;  %v1175_v12 = vmul.f32 %v1139_v53, %v1149_v61  ;;  %v530_v13 = vrot.slane %v1149_v61, 1  ;;  %v572_v14 = vrot.slane %v1149_v61, 2  ;;  %v614_v15 = vrot.slane %v1149_v61, 3 }
 0x223   :  { %v1181_v16 = vmul.f32 %v959_v11, %v193_v58  ;;  %v378_v17 = vrot.slane %v1163_v6, 5  ;;  %v382_v18 = vsel %vm379_vm1, %v375_v7, %v376_v62  ;;  %v420_v19 = vrot.slane %v1163_v6, 6 }
 0x224   :  { %v410_v21 = vmul.f32 %v1169_v8, %v382_v18  ;;  %v424_v22 = vsel %vm421_vm2, %v417_v9, %v418_v63  ;;  %v462_v23 = vrot.slane %v1163_v6, 7  ;;  %v466_v24 = vsel %vm463_vm3, %v459_v10, %v460_v0 }
 0x225   :  { %v377_v26 = vrot.slane %v1181_v16, 5  ;;  %v383_v27 = vsel %vm379_vm1, %v378_v17, %v375_v7  ;;  %v419_v28 = vrot.slane %v1181_v16, 6  ;;  %v425_v29 = vsel %vm421_vm2, %v420_v19, %v417_v9 }
 0x226   :  { %v400_v30 = vsel %vm388_vm4, %v383_v27, 0.0  ;;  %v442_v31 = vsel %vm430_vm5, %v425_v29, 0.0  ;;  %v452_v32 = vmul.f32 %v1192_v20, %v424_v22  ;;  %v461_v33 = vrot.slane %v1181_v16, 7 }
 0x227   :  { %v380_v35 = vsel %vm379_vm1, %v377_v26, %v378_v17  ;;  %v409_v36 = vmul.f32 %v1169_v8, %v400_v30  ;;  %v422_v37 = vsel %vm421_vm2, %v419_v28, %v420_v19  ;;  %v451_v38 = vmul.f32 %v1192_v20, %v442_v31 }
 0x228   :  { %v412_v39 = vmul.f32 %v1169_v8, %v380_v35  ;;  %v454_v40 = vmul.f32 %v1192_v20, %v422_v37  ;;  %v456_v41 = vadd.f32 %v452_v32, %v410_v21  ;;  %v464_v42 = vsel %vm463_vm3, %v461_v33, %v462_v23 }
 0x229   :  { %v455_v43 = vadd.f32 %v451_v38, %v409_v36  ;;  %v467_v46 = vsel %vm463_vm3, %v462_v23, %v459_v10  ;;  %v494_v52 = vmul.f32 %v1222_v34, %v466_v24  ;;  %v496_v56 = vmul.f32 %v1222_v34, %v464_v42 }
 0x22a   :  { %v458_v58 = vadd.f32 %v454_v40, %v412_v39  ;;  %v484_v1 = vsel %vm472_vm6, %v467_v46, 0.0  ;;  %v525_v7 = vmul.f32 %v1139_v53, %v1163_v6  ;;  %v532_v9 = vrot.slane %v1181_v16, 1  ;;  %v847_v39 = vld [vmem:[%s1403_s1 + $0xe] ss:$0 sm:$0xff] }
 0x22b   :  { %vm634_vm4 = vcmp.lt.s32.totalorder %v1132_v50, 16  ;;  %v493_v10 = vmul.f32 %v1222_v34, %v484_v1  ;;  %v498_v11 = vadd.f32 %v494_v52, %v456_v41  ;;  %v533_v17 = vrot.slane %v1163_v6, 1 }
 0x22c   :  { %v537_v44 = vsel %vm534_vm7, %v530_v13, %v531_v3  ;;  %v500_v18 = vadd.f32 %v496_v56, %v458_v58  ;;  %v536_v19 = vsel %vm534_vm7, %v531_v3, %v532_v9  ;;  %v574_v22 = vrot.slane %v1181_v16, 2  ;;  %v1285_v3 = vld [vmem:[%s1403_s1 + $0xd] ss:$0 sm:$0xff] }
 0x22d   :  { %v564_v21 = vmul.f32 %v1249_v57, %v537_v44  ;;  %vm432_vm5 = vcmp.ge.s32.totalorder %v1145_v59, 0  ;;  %vm474_vm6 = vcmp.ge.s32.totalorder %v1147_v60, 0  ;;  %v497_v23 = vadd.f32 %v493_v10, %v455_v43 }
 0x22e   :  { %v527_v24 = vadd.f32 %v1157_v2, %v498_v11  ;;  %v538_v27 = vsel %vm534_vm7, %v533_v17, %v530_v13  ;;  %v556_v29 = vsel %vm548_vm8, %v536_v19, 0.0  ;;  %v529_v30 = vadd.f32 %v525_v7, %v500_v18 }
 0x22f   :  { %v558_v31 = vsel %vm550_vm9, %v538_v27, 0.0  ;;  %v565_v32 = vmul.f32 %v1249_v57, %v556_v29  ;;  %v575_v2 = vrot.slane %v1163_v6, 2  ;;  %v526_v35 = vadd.f32 %v1175_v12, %v497_v23 }
 0x230   :  { %v567_v13 = vmul.f32 %v1249_v57, %v558_v31  ;;  %v578_v47 = vsel %vm576_vm10, %v573_v4, %v574_v22  ;;  %v579_v45 = vsel %vm576_vm10, %v572_v14, %v573_v4  ;;  %v617_v48 = vrot.slane %v1163_v6, 3 }
 0x231   :  { %v569_v36 = vadd.f32 %v565_v32, %v527_v24  ;;  %v580_v12 = vsel %vm576_vm10, %v575_v2, %v572_v14  ;;  %v598_v37 = vsel %vm590_vm11, %v578_v47, 0.0  ;;  %v606_v38 = vmul.f32 %v1285_v3, %v579_v45 }
 0x232   :  { %v568_v40 = vadd.f32 %v564_v21, %v526_v35  ;;  %v571_v41 = vadd.f32 %v567_v13, %v529_v30  ;;  %v600_v4 = vsel %vm592_vm12, %v580_v12, 0.0  ;;  %v607_v42 = vmul.f32 %v1285_v3, %v598_v37  ;;  %v849_v21 = vld [vmem:[%s1403_s1 + $0x5] ss:$0 sm:$0xff] }
 0x233   :  { %v609_v43 = vmul.f32 %v1285_v3, %v600_v4  ;;  %v616_v14 = vrot.slane %v1181_v16, 3  ;;  %v621_v46 = vsel %vm618_vm13, %v614_v15, %v615_v5  ;;  %v381_v49 = vsel %vm379_vm1, %v376_v62, %v377_v26 }
 0x234   :  { %v610_v52 = vadd.f32 %v606_v38, %v568_v40  ;;  %v611_v56 = vadd.f32 %v607_v42, %v569_v36  ;;  %v648_v58 = vmul.f32 %v847_v39, %v621_v46  ;;  %v622_v10 = vsel %vm618_vm13, %v617_v48, %v614_v15 }
 0x235   :  { %v613_v1 = vadd.f32 %v609_v43, %v571_v41  ;;  %v620_v7 = vsel %vm618_vm13, %v615_v5, %v616_v14  ;;  %v402_v11 = vsel %vm390_vm14, %v381_v49, 0.0  ;;  %v642_v62 = vsel %vm634_vm4, %v622_v10, 0.0  ;;  %v848_v5 = vld [vmem:[%s1403_s1 + $0x4] ss:$0 sm:$0xff] }
 0x236   :  { %v640_v44 = vsel %vm632_vm15, %v620_v7, 0.0  ;;  %v652_v26 = vadd.f32 %v648_v58, %v610_v52  ;;  %v411_v18 = vmul.f32 %v1169_v8, %v402_v11  ;;  %v651_v19 = vmul.f32 %v847_v39, %v642_v62 }
 0x237   :  { %v649_v61 = vmul.f32 %v847_v39, %v640_v44  ;;  %v423_v54 = vsel %vm421_vm2, %v418_v63, %v419_v28  ;;  %v465_v50 = vsel %vm463_vm3, %v460_v0, %v461_v33  ;;  %v535_v59 = vsel %vm534_vm7, %v532_v9, %v533_v17 }
 0x238   :  { %v660_v55 = vmul.f32 %v848_v5, %v652_v26  ;;  %v444_v8 = vsel %vm432_vm5, %v423_v54, 0.0  ;;  %v486_v15 = vsel %vm474_vm6, %v465_v50, 0.0  ;;  %v655_v63 = vadd.f32 %v651_v19, %v613_v1 }
 0x239   :  { %v653_v23 = vadd.f32 %v649_v61, %v611_v56  ;;  %v453_v28 = vmul.f32 %v1192_v20, %v444_v8  ;;  %v495_v0 = vmul.f32 %v1222_v34, %v486_v15  ;;  %v524_v31 = vmul.f32 %v1139_v53, %v1181_v16  ;;  %v854_v56 = vld [vmem:[%s1403_s1 + $0x6] ss:$0 sm:$0xff]  ;;  %s976_s1 = scalar_lea.vmem %s815_s16, 512 }
 0x23a   :  { %v668_v24 = vadd.f32 %v849_v21, %v660_v55  ;;  %v663_v33 = vmul.f32 %v848_v5, %v655_v63  ;;  %v577_v20 = vsel %vm576_vm10, %v574_v22, %v575_v2  ;;  %v566_v6 = vmul.f32 %v1249_v57, %v535_v59  ;;  %p977_p0 = scmp.ne.s32.totalorder %s815_s16, %s976_s1  ;;  %p982_p2 = scmp.lt.s32.totalorder %s976_s1, %s976_s1 }
 0x23b   :  { %v661_v51 = vmul.f32 %v848_v5, %v653_v23  ;;  %v457_v27 = vadd.f32 %v453_v28, %v411_v18  ;;  %v619_v13 = vsel %vm618_vm13, %v616_v14, %v617_v48  ;;  %v608_v17 = vmul.f32 %v1285_v3, %v577_v20 }
 0x23c   :  { %v850_v29 = vmul.f32 -1.442695, %v668_v24  ;;  %v671_v35 = vadd.f32 %v849_v21, %v663_v33  ;;  %v650_v53 = vmul.f32 %v847_v39, %v619_v13  ;;  %p983_p3 = por %p982_p2, %p981_p1 }
 0x23d   :  { %v669_v60 = vadd.f32 %v849_v21, %v661_v51  ;;  %v499_v30 = vadd.f32 %v495_v0, %v457_v27 }
 0x23e   :  { %960 = vpow2.f32 %v850_v29  ;;  %v853_v45 = vmul.f32 -1.442695, %v671_v35  ;;  %p984_p4 = pnand %p983_p3, %p977_p0 }
 0x23f   :  { %v851_v34 = vmul.f32 -1.442695, %v669_v60  ;;  %v528_v32 = vadd.f32 %v524_v31, %v499_v30 }
 0x241   :  { %962 = vpow2.f32 %v851_v34  ;;  %v570_v9 = vadd.f32 %v566_v6, %v528_v32 }
 0x242   :  { %964 = vpow2.f32 %v853_v45 }
 0x243   :  { %v612_v47 = vadd.f32 %v608_v17, %v570_v9 }
 0x245   :  { %v654_v36 = vadd.f32 %v650_v53, %v612_v47 }
 0x247   :  { %v662_v16 = vmul.f32 %v848_v5, %v654_v36 }
 0x249   :  { %v670_v12 = vadd.f32 %v849_v21, %v662_v16 }
 0x24b   :  { %v961_v22 = vpop.eup %960  ;;  %v852_v2 = vmul.f32 -1.442695, %v670_v12 }
 0x24c   :  { %v684_v37 = vadd.f32 1.0, %v961_v22 }
 0x24d   :  { %966 = vpow2.f32 %v852_v2 }
 0x24e   :  { %v963_v57 = vpop.eup %962  ;;  %968 = vrcp.f32 %v684_v37 }
 0x24f   :  { %v685_v38 = vadd.f32 1.0, %v963_v57  ;;  %v965_v25 = vpop.eup %964 }
 0x250   :  { %v687_v40 = vadd.f32 1.0, %v965_v25 }
 0x251   :  { %970 = vrcp.f32 %v685_v38 }
 0x252   :  { %972 = vrcp.f32 %v687_v40 }
 0x25a   :  { %v967_v41 = vpop.eup %966 }
 0x25b   :  { %v969_v4 = vpop.eup %968  ;;  %v686_v3 = vadd.f32 1.0, %v967_v41 }
 0x25c   :  { %v696_v39 = vmul.f32 %v969_v4, %v668_v24 }
 0x25d   :  { %974 = vrcp.f32 %v686_v3 }
 0x25e   :  { %v971_v42 = vpop.eup %970  ;;  %919 = vmatprep.mubr.msk.f32.mxu0 %vm26_vm0, %v696_v39 }
 0x25f   :  { %v697_v43 = vmul.f32 %v971_v42, %v669_v60  ;;  %v973_v14 = vpop.eup %972 }
 0x260   :  { %v699_v52 = vmul.f32 %v973_v14, %v671_v35 }
 0x261   :  { %920 = vmatmul.mubr.msk.f32.vlgmr.msra.gmra.mxu0 %vm26_vm0, %v697_v43 }
 0x26a   :  { %v975_v48 = vpop.eup %974 }
 0x26b   :  { %v698_v46 = vmul.f32 %v975_v48, %v670_v12 }
 0x26d   :  { %922 = vmatprep.mubr.msk.f32.mxu1 %vm26_vm0, %v698_v46 }
 0x26e   :  { %923 = vmatmul.mubr.msk.f32.vlgmr.msra.gmra.mxu1 %vm26_vm0, %v699_v52 }
 0x321   :  { %v921_v58 = vpop.f32.mrf.mxu0 }
 0x322   :  { %v792_v49 = vadd.f32 %v921_v58, %v854_v56 }
 0x323   :  { %v786_v1 = vpop.f32.mrf.mxu0 }
 0x324   :  { %806 = vst.msk [vmem:[#allocation2 + $0x8] sm:$0xff] %vm26_vm0, %v792_v49  ;;  %v787_v7 = vadd.f32 %v854_v56, %v786_v1 }
 0x326   :  { %805 = vst.msk [vmem:[#allocation2] sm:$0xff] %vm26_vm0, %v787_v7 }
 0x32e   :  { %v924_v10 = vpop.f32.mrf.mxu1 }
 0x32f   :  { %v802_v11 = vadd.f32 %v924_v10, %v854_v56 }
 0x330   :  { %v796_v44 = vpop.f32.mrf.mxu1 }
 0x331   :  { %808 = vst.msk [vmem:[#allocation2 + $0x18] sm:$0xff] %vm26_vm0, %v802_v11  ;;  %v797_v62 = vadd.f32 %v854_v56, %v796_v44 }
 0x333   :  { %807 = vst.msk [vmem:[#allocation2 + $0x10] sm:$0xff] %vm26_vm0, %v797_v62 }
 0x334   :  { %987 = shalt.err (!%p984_p4)
}
 0x335   :  { %s999_s17 = smov 128   ;;  %s1000_s18 = smov 8  }
 0x336   :  { %820 = dma.vmem_to_hbm [thread:$0]  %s815_s16, 512, %s1405_s3, [#allocation3], %s999_s17, %s999_s17, %s1000_s18  }
 0x337   :  { %996 = dma.done.wait [#allocation3], 512  }
 0x338   :  { %997 = vsyncadd [#allocation3], 4294966784 }
 0x339   :  { %824 = vsyncpa [#allocation3], 1 }

</bundles_post_ra>
